<compile_context>
chip_gen: v7x
topology: tpu7x:2x2x1
jax: 0.10.0
libtpu: 0.0.40
codegen_flags: <defaults>
</compile_context>

<pallas_src>
import jax
import jax.numpy as jnp
from jax import lax
from jax.experimental import pallas as pl
from jax.experimental.pallas import tpu as pltpu

LANES = 128
NEG_INF = float("-inf")


def _round_up(x, m):
    return (x + m - 1) // m * m


# ---------------------------------------------------------------------------
# Phase 1: before/after pooling scan -> fused bf16 [x | before | after] slab.
# ---------------------------------------------------------------------------
def _make_scan_kernel(mode, n, n_pad, dim_p, ts):
    nb = n_pad // ts
    f32, bf16 = jnp.float32, jnp.bfloat16
    shifts = []
    k = 1
    while k < ts:
        shifts.append(k)
        k *= 2
    use_mxu_scan = (mode == "mean") and ts >= 64
    need_masks = (mode == "max") or (not use_mxu_scan)
    unroll = True if nb <= 4 else False

    def seg(s):  # lane-aligned 128-wide column segment of the cat slab
        return pl.ds(s * dim_p, dim_p)

    def kernel(x_ref, cat_ref):
        # -------- loop-invariant constants (JAX does not CSE these) --------
        row = lax.broadcasted_iota(jnp.int32, (ts, 1), 0)          # local row idx
        if need_masks:
            dn_masks = [row >= k for k in shifts]                  # prefix shifts
            up_masks = [row < ts - k for k in shifts]              # suffix shifts
        if use_mxu_scan:
            rr = lax.broadcasted_iota(jnp.int32, (ts, ts), 0)
            cc = lax.broadcasted_iota(jnp.int32, (ts, ts), 1)
            ltri = (cc <= rr).astype(f32)                          # incl. lower tri
            utri = (cc >= rr).astype(f32)                          # incl. upper tri

        def shift_down(t, k, fill, mask):    # out[i] = t[i-k] if i >= k else fill
            return jnp.where(mask, pltpu.roll(t, shift=k, axis=0), fill)

        def shift_up(t, k, fill, mask):      # out[i] = t[i+k] if i < ts-k else fill
            return jnp.where(mask, pltpu.roll(t, shift=(ts - k) % ts, axis=0), fill)

        def incl_scan(t, combine, identity, up):
            masks = up_masks if up else dn_masks
            sh = shift_up if up else shift_down
            for k, m in zip(shifts, masks):
                t = combine(t, sh(t, k, identity, m))
            return t

        def body(j, carries):
            cf, cr = carries
            # ---- forward tile j: x segment + exclusive "before" pooling ----
            r0 = pl.multiple_of(j * ts, ts)
            xt = x_ref[pl.ds(r0, ts), :].astype(f32)
            cat_ref[pl.ds(r0, ts), seg(0)] = xt.astype(bf16)
            gi = r0 + row
            # ---- reverse tile nb-1-j: exclusive "after" pooling ----
            rr0 = pl.multiple_of((nb - 1 - j) * ts, ts)
            xr = x_ref[pl.ds(rr0, ts), :].astype(f32)
            gj = rr0 + row

            if mode == "mean":
                if use_mxu_scan:
                    incl_f = jnp.dot(ltri, xt, preferred_element_type=f32)
                    incl_r = jnp.dot(utri, xr, preferred_element_type=f32)
                else:
                    incl_f = incl_scan(xt, jnp.add, 0.0, up=False)
                    incl_r = incl_scan(xr, jnp.add, 0.0, up=True)
                inv_b = jnp.where(gi >= 1,
                                  1.0 / jnp.maximum(gi.astype(f32), 1.0), 0.0)
                inv_a = jnp.where(gj <= n - 2,
                                  1.0 / jnp.maximum(jnp.float32(n - 1) - gj.astype(f32),
                                                    1.0), 0.0)
                before = (cf + (incl_f - xt)) * inv_b
                after = (cr + (incl_r - xr)) * inv_a
                cf_new = cf + incl_f[ts - 1:ts, :]
                cr_new = cr + incl_r[0:1, :]
            else:  # max
                xr_m = jnp.where(gj < n, xr, NEG_INF)      # padded rows -> identity
                incl_f = incl_scan(xt, jnp.maximum, NEG_INF, up=False)
                incl_r = incl_scan(xr_m, jnp.maximum, NEG_INF, up=True)
                excl_f = shift_down(incl_f, 1, NEG_INF, dn_masks[0])
                excl_r = shift_up(incl_r, 1, NEG_INF, up_masks[0])
                before = jnp.maximum(cf, excl_f)
                after = jnp.maximum(cr, excl_r)
                cf_new = jnp.maximum(cf, incl_f[ts - 1:ts, :])
                cr_new = jnp.maximum(cr, incl_r[0:1, :])

            cat_ref[pl.ds(r0, ts), seg(1)] = before.astype(bf16)
            cat_ref[pl.ds(rr0, ts), seg(2)] = after.astype(bf16)
            return cf_new, cr_new

        init = (jnp.zeros((1, dim_p), f32) if mode == "mean"
                else jnp.full((1, dim_p), NEG_INF, f32))
        lax.fori_loop(0, nb, body, (init, init), unroll=unroll)

        # Module convention: before[0] = 0 and after[n-1] = 0 (also scrubs the
        # -inf max-scan identities before they can reach the MXU).
        zero_row = jnp.zeros((1, dim_p), bf16)
        cat_ref[0:1, seg(1)] = zero_row
        cat_ref[n - 1:n, seg(2)] = zero_row
        if n_pad > n:   # padded rows -> benign zeros (their outputs are sliced off)
            cat_ref[n:n_pad, :] = jnp.zeros((n_pad - n, 3 * dim_p), bf16)

    return kernel


def _scan_call(x_p, mode, n, n_pad, dim_p, ts):
    kernel = _make_scan_kernel(mode, n, n_pad, dim_p, ts)
    vmem = pl.BlockSpec(memory_space=pltpu.MemorySpace.VMEM)
    need = n_pad * dim_p * x_p.dtype.itemsize + n_pad * 3 * dim_p * 2
    # clamp below v7x's 64 MiB physical VMEM (headroom for compiler scratch)
    vmem_limit = int(min(48 * 2**20, max(16 * 2**20, 2 * need)))
    return pl.pallas_call(
        kernel,
        out_shape=jax.ShapeDtypeStruct((n_pad, 3 * dim_p), jnp.bfloat16),
        in_specs=[vmem],
        out_specs=vmem,
        compiler_params=pltpu.CompilerParams(vmem_limit_bytes=vmem_limit),
    )(x_p)


# ---------------------------------------------------------------------------
# Phase 2: row-tiled grid: cat @ W1 -> ReLU -> LayerNorm -> @ W2 -> gamma -> +x
# ---------------------------------------------------------------------------
def _make_mlp_kernel(ff, ff_p, eps=1e-6):
    f32 = jnp.float32

    def kernel(cat_ref, x_ref, w1_ref, b1_ref, lnw_ref, lnb_ref, w2_ref, b2_ref,
               gamma_ref, out_ref):
        # bf16 MXU matmul, f32 accumulation
        h = jnp.dot(cat_ref[...], w1_ref[...], preferred_element_type=f32)
        h = jnp.maximum(h + b1_ref[...], 0.0)                            # ReLU

        # LayerNorm(ff, eps=1e-6), stats masked to the real ff columns (f32).
        col = lax.broadcasted_iota(jnp.int32, (1, ff_p), 1)
        inv_ff = jnp.float32(1.0 / ff)
        mu = jnp.sum(h, axis=-1, keepdims=True) * inv_ff   # padded h cols are exact 0
        hc = jnp.where(col < ff, h - mu, 0.0)
        var = jnp.sum(hc * hc, axis=-1, keepdims=True) * inv_ff
        hn = hc * lax.rsqrt(var + eps) * lnw_ref[...] + lnb_ref[...]

        # TODO(synk): dropout omitted (eval-mode identity; p only matters in training).

        y = jnp.dot(hn.astype(jnp.bfloat16), w2_ref[...],
                    preferred_element_type=f32)
        y = (y + b2_ref[...]) * gamma_ref[...]
        out_ref[...] = (y + x_ref[...].astype(f32)).astype(out_ref.dtype)

    return kernel


def _mlp_call(cat, x_p, prep, n_pad, tm, dim_p, ff, ff_p):
    kernel = _make_mlp_kernel(ff, ff_p)
    grid = (n_pad // tm,)

    def row_spec(shape):
        return pl.BlockSpec(shape, lambda i: (i, 0))

    def full_spec(shape):
        return pl.BlockSpec(shape, lambda i: (0, 0))

    flops = 2 * n_pad * (3 * dim_p * ff_p + ff_p * dim_p)
    bytes_accessed = (n_pad * 3 * dim_p * 2                       # cat (bf16)
                      + 2 * n_pad * dim_p * x_p.dtype.itemsize    # x + out
                      + 3 * dim_p * ff_p * 2 + ff_p * dim_p * 2   # weights (bf16)
                      + 4 * (3 * ff_p + 2 * dim_p))               # biases / LN / gamma
    step_bytes = (2 * (tm * 3 * dim_p * 2 + 2 * tm * dim_p * 4)   # double-buffered tiles
                  + 3 * dim_p * ff_p * 2 + ff_p * dim_p * 2       # resident weights
                  + 2 * tm * ff_p * 4)                            # h / hn temporaries
    vmem_limit = int(min(48 * 2**20, max(16 * 2**20, 2 * step_bytes)))

    return pl.pallas_call(
        kernel,
        out_shape=jax.ShapeDtypeStruct((n_pad, dim_p), x_p.dtype),
        grid=grid,
        in_specs=[
            row_spec((tm, 3 * dim_p)),      # cat row tile
            row_spec((tm, dim_p)),          # x row tile (residual)
            full_spec((3 * dim_p, ff_p)),   # w1 (bf16)
            full_spec((1, ff_p)),           # b1
            full_spec((1, ff_p)),           # ln_w
            full_spec((1, ff_p)),           # ln_b
            full_spec((ff_p, dim_p)),       # w2 (bf16)
            full_spec((1, dim_p)),          # b2
            full_spec((1, dim_p)),          # gamma
        ],
        out_specs=row_spec((tm, dim_p)),
        cost_estimate=pl.CostEstimate(flops=flops, transcendentals=n_pad,
                                      bytes_accessed=bytes_accessed),
        compiler_params=pltpu.CompilerParams(
            dimension_semantics=("parallel",),   # megacore sharding on v7x
            vmem_limit_bytes=vmem_limit),
    )(cat, x_p, prep["w1"], prep["b1"], prep["ln_w"], prep["ln_b"],
      prep["w2"], prep["b2"], prep["gamma"])


# ---------------------------------------------------------------------------
# Wrapper
# ---------------------------------------------------------------------------
def prepare_params(params, dim, ff):
    """Pad / cast the module weights ONCE (weights stored transposed (in, out))."""
    dim_p = _round_up(dim, LANES)
    ff_p = _round_up(ff, LANES)
    f32, bf16 = jnp.float32, jnp.bfloat16

    w1_p = jnp.zeros((3 * dim_p, ff_p), bf16)
    for k in range(3):   # keep each cat segment lane-aligned in the K dimension
        w1_p = w1_p.at[k * dim_p:k * dim_p + dim, :ff].set(
            params["w1"][k * dim:(k + 1) * dim].astype(bf16))

    def pad_row(v, w):
        return jnp.zeros((1, w), f32).at[:, :v.shape[-1]].set(
            v.reshape(1, -1).astype(f32))

    return dict(
        dim=dim, ff=ff, dim_p=dim_p, ff_p=ff_p,
        w1=w1_p,
        b1=pad_row(params["b1"], ff_p),
        ln_w=pad_row(params["ln_w"], ff_p),
        ln_b=pad_row(params["ln_b"], ff_p),
        w2=jnp.zeros((ff_p, dim_p), bf16).at[:ff, :dim].set(params["w2"].astype(bf16)),
        b2=pad_row(params["b2"], dim_p),
        gamma=pad_row(params["gamma"], dim_p),
    )


def before_after_pool_block(x, prep, mode: str):
    if mode not in ("mean", "max"):
        raise ValueError(f"Invalid pool mode: {mode}")
    n, dim = x.shape
    assert dim == prep["dim"]
    dim_p, ff, ff_p = prep["dim_p"], prep["ff"], prep["ff_p"]

    n8 = max(_round_up(n, 8), 8)
    if n8 >= 256:
        tm = 256                       # good MXU M-dim utilization
        n_pad = _round_up(n8, tm)
        ts = 128                       # scan tile (divides n_pad)
    else:
        tm = n_pad = ts = n8           # tiny sequences: single tile

    x_p = jnp.zeros((n_pad, dim_p), x.dtype).at[:n, :dim].set(x)
    cat = _scan_call(x_p, mode, n, n_pad, dim_p, ts)
    out = _mlp_call(cat, x_p, prep, n_pad, tm, dim_p, ff, ff_p)
    return out[:n, :dim]


# ----------------------------- pure-JAX reference ----------------------------
def _ref_forward(x, params, mode):
    n, d = x.shape
    x = x.astype(jnp.float32)
    if mode == "mean":
        csum = jnp.cumsum(x, axis=0)
        idx = jnp.arange(1, n, dtype=jnp.float32)[:, None]
        before = jnp.concatenate([jnp.zeros((1, d), jnp.float32), csum[:-1] / idx], 0)
        rsum = jnp.cumsum(x[::-1], axis=0)[::-1]
        cnt = (n - 1) - jnp.arange(0, n - 1, dtype=jnp.float32)[:, None]
        after = jnp.concatenate([rsum[1:] / cnt, jnp.zeros((1, d), jnp.float32)], 0)
    else:
        cmax = lax.cummax(x, axis=0)
        before = jnp.concatenate([jnp.zeros((1, d), jnp.float32), cmax[:-1]], 0)
        rmax = lax.cummax(x[::-1], axis=0)[::-1]
        after = jnp.concatenate([rmax[1:], jnp.zeros((1, d), jnp.float32)], 0)

    cat = jnp.concatenate([x, before, after], axis=1)
    hi = lax.Precision.HIGHEST
    h = jax.nn.relu(jnp.dot(cat, params["w1"], precision=hi) + params["b1"])
    mu = h.mean(-1, keepdims=True)
    var = ((h - mu) ** 2).mean(-1, keepdims=True)
    h = (h - mu) / jnp.sqrt(var + 1e-6) * params["ln_w"] + params["ln_b"]
    y = jnp.dot(h, params["w2"], precision=hi) + params["b2"]
    y = y * params["gamma"]
    return y + x


if __name__ == "__main__":
    key = jax.random.PRNGKey(0)
    dim, ff = 32, 64                  # dim=32, dim_feedforward=64
    ls_init_value = 1.0               # configurable in __init__ (default 1e-6)
    ks = jax.random.split(key, 8)

    params = dict(
        w1=0.05 * jax.random.normal(ks[1], (3 * dim, ff), jnp.float32),   # linear1.weight.T
        b1=0.05 * jax.random.normal(ks[2], (1, ff), jnp.float32),
        w2=0.05 * jax.random.normal(ks[3], (ff, dim), jnp.float32),       # linear2.weight.T
        b2=0.05 * jax.random.normal(ks[4], (1, dim), jnp.float32),
        ln_w=jnp.ones((1, ff), jnp.float32)
             + 0.1 * jax.random.normal(ks[5], (1, ff), jnp.float32),
        ln_b=0.1 * jax.random.normal(ks[6], (1, ff), jnp.float32),
        gamma=ls_init_value * jnp.ones((1, dim), jnp.float32),
    )
    prep = prepare_params(params, dim, ff)   # pad/cast weights once

    ok = True
    # n=8 exercises the single-tile Hillis-Steele path; n=384 exercises the
    # triangular-MXU mean scan, wide max scans, and the multi-tile parallel grid.
    for n, xk in ((8, ks[0]), (384, ks[7])):
        x = jax.random.normal(xk, (n, dim), jnp.float32)
        for mode in ("mean", "max"):
            out = before_after_pool_block(x, prep, mode)
            jax.block_until_ready(out)
            ref = _ref_forward(x, params, mode)
            err = float(jnp.max(jnp.abs(out - ref)))
            # bf16 matmul inputs (f32 accumulation) vs f32 HIGHEST reference.
            if err > 2e-2:
                ok = False
                print(f"n={n} mode={mode}: max abs err = {err}")

    if ok:
        print("KERNEL_OK")
</pallas_src>

<mosaic_0001>
module attributes {stable_mosaic.version = 11 : i64} {
  func.func @kernel(%arg0: memref<8x128xf32, #tpu.memory_space<vmem>>, %arg1: memref<8x384xbf16, #tpu.memory_space<vmem>>) attributes {dimension_semantics = [], scalar_prefetch = 0 : i64, scratch_operands = 0 : i64, tpu.core_type = #tpu.core_type<tc>} {
    %0 = tpu.iota {dimensions = array<i32: 0>} : vector<8x1xi32>
    %c1_i32 = arith.constant 1 : i32
    %1 = vector.broadcast %c1_i32 : i32 to vector<8x1xi32>
    %2 = arith.cmpi sge, %0, %1 : vector<8x1xi32>
    %c2_i32 = arith.constant 2 : i32
    %3 = vector.broadcast %c2_i32 : i32 to vector<8x1xi32>
    %4 = arith.cmpi sge, %0, %3 : vector<8x1xi32>
    %c4_i32 = arith.constant 4 : i32
    %5 = vector.broadcast %c4_i32 : i32 to vector<8x1xi32>
    %6 = arith.cmpi sge, %0, %5 : vector<8x1xi32>
    %c7_i32 = arith.constant 7 : i32
    %7 = vector.broadcast %c7_i32 : i32 to vector<8x1xi32>
    %8 = arith.cmpi slt, %0, %7 : vector<8x1xi32>
    %c6_i32 = arith.constant 6 : i32
    %9 = vector.broadcast %c6_i32 : i32 to vector<8x1xi32>
    %10 = arith.cmpi slt, %0, %9 : vector<8x1xi32>
    %c4_i32_0 = arith.constant 4 : i32
    %11 = vector.broadcast %c4_i32_0 : i32 to vector<8x1xi32>
    %12 = arith.cmpi slt, %0, %11 : vector<8x1xi32>
    %cst = arith.constant 0.000000e+00 : f32
    %13 = vector.broadcast %cst : f32 to vector<1x128xf32>
    %c0_i32 = arith.constant 0 : i32
    %c8_i32 = arith.constant 8 : i32
    %14 = arith.muli %c0_i32, %c8_i32 : i32
    %15 = tpu.assume_multiple %14, 8 : i32
    %16 = arith.index_cast %15 : i32 to index
    %c0 = arith.constant 0 : index
    %17 = vector.load %arg0[%16, %c0] : memref<8x128xf32, #tpu.memory_space<vmem>>, vector<8x128xf32>
    %18 = arith.truncf %17 : vector<8x128xf32> to vector<8x128xbf16>
    %19 = arith.index_cast %15 : i32 to index
    %c0_1 = arith.constant 0 : index
    %20 = vector.load %arg1[%19, %c0_1] : memref<8x384xbf16, #tpu.memory_space<vmem>>, vector<8x128xbf16>
    tpu.vector_store %arg1[%19, %c0_1], %18 {strides = array<i32>} : memref<8x384xbf16, #tpu.memory_space<vmem>>, vector<8x128xbf16>,
    %21 = vector.broadcast %15 : i32 to vector<8x1xi32>
    %22 = arith.addi %21, %0 : vector<8x1xi32>
    %c0_i32_2 = arith.constant 0 : i32
    %23 = arith.subi %c0_i32_2, %c0_i32 : i32
    %c8_i32_3 = arith.constant 8 : i32
    %24 = arith.muli %23, %c8_i32_3 : i32
    %25 = tpu.assume_multiple %24, 8 : i32
    %26 = arith.index_cast %25 : i32 to index
    %c0_4 = arith.constant 0 : index
    %27 = vector.load %arg0[%26, %c0_4] : memref<8x128xf32, #tpu.memory_space<vmem>>, vector<8x128xf32>
    %28 = vector.broadcast %25 : i32 to vector<8x1xi32>
    %29 = arith.addi %28, %0 : vector<8x1xi32>
    %c1_i32_5 = arith.constant 1 : i32
    %30 = tpu.dynamic_rotate %17 by %c1_i32_5 dim 0 : vector<8x128xf32>, i32 -> vector<8x128xf32>
    %cst_6 = arith.constant 0.000000e+00 : f32
    %31 = vector.shape_cast %2 : vector<8x1xi1> to vector<8x1xi1>
    %32 = vector.broadcast %31 : vector<8x1xi1> to vector<8x128xi1>
    %33 = vector.broadcast %cst_6 : f32 to vector<8x128xf32>
    %34 = arith.select %32, %30, %33 : vector<8x128xi1>, vector<8x128xf32>
    %35 = arith.addf %17, %34 : vector<8x128xf32>
    %c2_i32_7 = arith.constant 2 : i32
    %36 = tpu.dynamic_rotate %35 by %c2_i32_7 dim 0 : vector<8x128xf32>, i32 -> vector<8x128xf32>
    %cst_8 = arith.constant 0.000000e+00 : f32
    %37 = vector.shape_cast %4 : vector<8x1xi1> to vector<8x1xi1>
    %38 = vector.broadcast %37 : vector<8x1xi1> to vector<8x128xi1>
    %39 = vector.broadcast %cst_8 : f32 to vector<8x128xf32>
    %40 = arith.select %38, %36, %39 : vector<8x128xi1>, vector<8x128xf32>
    %41 = arith.addf %35, %40 : vector<8x128xf32>
    %c4_i32_9 = arith.constant 4 : i32
    %42 = tpu.dynamic_rotate %41 by %c4_i32_9 dim 0 : vector<8x128xf32>, i32 -> vector<8x128xf32>
    %cst_10 = arith.constant 0.000000e+00 : f32
    %43 = vector.shape_cast %6 : vector<8x1xi1> to vector<8x1xi1>
    %44 = vector.broadcast %43 : vector<8x1xi1> to vector<8x128xi1>
    %45 = vector.broadcast %cst_10 : f32 to vector<8x128xf32>
    %46 = arith.select %44, %42, %45 : vector<8x128xi1>, vector<8x128xf32>
    %47 = arith.addf %41, %46 : vector<8x128xf32>
    %c7_i32_11 = arith.constant 7 : i32
    %48 = tpu.dynamic_rotate %27 by %c7_i32_11 dim 0 : vector<8x128xf32>, i32 -> vector<8x128xf32>
    %cst_12 = arith.constant 0.000000e+00 : f32
    %49 = vector.shape_cast %8 : vector<8x1xi1> to vector<8x1xi1>
    %50 = vector.broadcast %49 : vector<8x1xi1> to vector<8x128xi1>
    %51 = vector.broadcast %cst_12 : f32 to vector<8x128xf32>
    %52 = arith.select %50, %48, %51 : vector<8x128xi1>, vector<8x128xf32>
    %53 = arith.addf %27, %52 : vector<8x128xf32>
    %c6_i32_13 = arith.constant 6 : i32
    %54 = tpu.dynamic_rotate %53 by %c6_i32_13 dim 0 : vector<8x128xf32>, i32 -> vector<8x128xf32>
    %cst_14 = arith.constant 0.000000e+00 : f32
    %55 = vector.shape_cast %10 : vector<8x1xi1> to vector<8x1xi1>
    %56 = vector.broadcast %55 : vector<8x1xi1> to vector<8x128xi1>
    %57 = vector.broadcast %cst_14 : f32 to vector<8x128xf32>
    %58 = arith.select %56, %54, %57 : vector<8x128xi1>, vector<8x128xf32>
    %59 = arith.addf %53, %58 : vector<8x128xf32>
    %c4_i32_15 = arith.constant 4 : i32
    %60 = tpu.dynamic_rotate %59 by %c4_i32_15 dim 0 : vector<8x128xf32>, i32 -> vector<8x128xf32>
    %cst_16 = arith.constant 0.000000e+00 : f32
    %61 = vector.shape_cast %12 : vector<8x1xi1> to vector<8x1xi1>
    %62 = vector.broadcast %61 : vector<8x1xi1> to vector<8x128xi1>
    %63 = vector.broadcast %cst_16 : f32 to vector<8x128xf32>
    %64 = arith.select %62, %60, %63 : vector<8x128xi1>, vector<8x128xf32>
    %65 = arith.addf %59, %64 : vector<8x128xf32>
    %c1_i32_17 = arith.constant 1 : i32
    %66 = vector.broadcast %c1_i32_17 : i32 to vector<8x1xi32>
    %67 = arith.cmpi sge, %22, %66 : vector<8x1xi32>
    %68 = arith.sitofp %22 : vector<8x1xi32> to vector<8x1xf32>
    %cst_18 = arith.constant 1.000000e+00 : f32
    %69 = vector.broadcast %cst_18 : f32 to vector<8x1xf32>
    %70 = arith.maximumf %68, %69 : vector<8x1xf32>
    %cst_19 = arith.constant 1.000000e+00 : f32
    %71 = vector.broadcast %cst_19 : f32 to vector<8x1xf32>
    %72 = arith.divf %71, %70 : vector<8x1xf32>
    %cst_20 = arith.constant 0.000000e+00 : f32
    %73 = vector.broadcast %cst_20 : f32 to vector<8x1xf32>
    %74 = arith.select %67, %72, %73 : vector<8x1xi1>, vector<8x1xf32>
    %c6_i32_21 = arith.constant 6 : i32
    %75 = vector.broadcast %c6_i32_21 : i32 to vector<8x1xi32>
    %76 = arith.cmpi sle, %29, %75 : vector<8x1xi32>
    %77 = arith.sitofp %29 : vector<8x1xi32> to vector<8x1xf32>
    %cst_22 = arith.constant 7.000000e+00 : f32
    %78 = vector.broadcast %cst_22 : f32 to vector<8x1xf32>
    %79 = arith.subf %78, %77 : vector<8x1xf32>
    %cst_23 = arith.constant 1.000000e+00 : f32
    %80 = vector.broadcast %cst_23 : f32 to vector<8x1xf32>
    %81 = arith.maximumf %79, %80 : vector<8x1xf32>
    %cst_24 = arith.constant 1.000000e+00 : f32
    %82 = vector.broadcast %cst_24 : f32 to vector<8x1xf32>
    %83 = arith.divf %82, %81 : vector<8x1xf32>
    %cst_25 = arith.constant 0.000000e+00 : f32
    %84 = vector.broadcast %cst_25 : f32 to vector<8x1xf32>
    %85 = arith.select %76, %83, %84 : vector<8x1xi1>, vector<8x1xf32>
    %86 = arith.subf %47, %17 : vector<8x128xf32>
    %87 = vector.broadcast %13 : vector<1x128xf32> to vector<8x128xf32>
    %88 = arith.addf %87, %86 : vector<8x128xf32>
    %89 = vector.broadcast %74 : vector<8x1xf32> to vector<8x128xf32>
    %90 = arith.mulf %88, %89 : vector<8x128xf32>
    %91 = arith.subf %65, %27 : vector<8x128xf32>
    %92 = vector.broadcast %13 : vector<1x128xf32> to vector<8x128xf32>
    %93 = arith.addf %92, %91 : vector<8x128xf32>
    %94 = vector.broadcast %85 : vector<8x1xf32> to vector<8x128xf32>
    %95 = arith.mulf %93, %94 : vector<8x128xf32>
    %96 = vector.extract_strided_slice %47 {offsets = [7, 0], sizes = [1, 128], strides = [1, 1]} : vector<8x128xf32> to vector<1x128xf32>
    %97 = arith.addf %13, %96 : vector<1x128xf32>
    %98 = vector.extract_strided_slice %65 {offsets = [0, 0], sizes = [1, 128], strides = [1, 1]} : vector<8x128xf32> to vector<1x128xf32>
    %99 = arith.addf %13, %98 : vector<1x128xf32>
    %100 = arith.truncf %90 : vector<8x128xf32> to vector<8x128xbf16>
    %101 = arith.index_cast %15 : i32 to index
    %c128 = arith.constant 128 : index
    %102 = vector.load %arg1[%101, %c128] : memref<8x384xbf16, #tpu.memory_space<vmem>>, vector<8x128xbf16>
    tpu.vector_store %arg1[%101, %c128], %100 {strides = array<i32>} : memref<8x384xbf16, #tpu.memory_space<vmem>>, vector<8x128xbf16>,
    %103 = arith.truncf %95 : vector<8x128xf32> to vector<8x128xbf16>
    %104 = arith.index_cast %25 : i32 to index
    %c256 = arith.constant 256 : index
    %105 = vector.load %arg1[%104, %c256] : memref<8x384xbf16, #tpu.memory_space<vmem>>, vector<8x128xbf16>
    tpu.vector_store %arg1[%104, %c256], %103 {strides = array<i32>} : memref<8x384xbf16, #tpu.memory_space<vmem>>, vector<8x128xbf16>,
    %c1_i32_26 = arith.constant 1 : i32
    %cst_27 = arith.constant 0.000000e+00 : bf16
    %106 = vector.broadcast %cst_27 : bf16 to vector<1x128xbf16>
    %c0_28 = arith.constant 0 : index
    %c128_29 = arith.constant 128 : index
    %107 = vector.load %arg1[%c0_28, %c128_29] : memref<8x384xbf16, #tpu.memory_space<vmem>>, vector<1x128xbf16>
    tpu.vector_store %arg1[%c0_28, %c128_29], %106 {strides = array<i32>} : memref<8x384xbf16, #tpu.memory_space<vmem>>, vector<1x128xbf16>,
    %c7 = arith.constant 7 : index
    %c256_30 = arith.constant 256 : index
    %108 = vector.load %arg1[%c7, %c256_30] : memref<8x384xbf16, #tpu.memory_space<vmem>>, vector<1x128xbf16>
    tpu.vector_store %arg1[%c7, %c256_30], %106 {strides = array<i32>} : memref<8x384xbf16, #tpu.memory_space<vmem>>, vector<1x128xbf16>,
    return
  }
}

</mosaic_0001>

<bundles_post_ra>
// kernel: tpu_custom_call.1
= control target key start
LH: loop header
LB: loop body
LE: loop exit
PB: predicated region body
PF: predicated region fallthrough
CT: control target
= control target key end

     0   :  { %6 = vsyncpa [#allocation3], 0  ;;  %s210_s0 = inlined_call_operand.hbm [shape: f32[8,128], index: 0, kind: input, shape index: {}]   ;;  %s211_s1 = inlined_call_operand.hbm [shape: bf16[8,384], index: 1, kind: output, shape index: {}]  }
   0x1   :  { %7 = vsyncpa [#allocation4], 0  ;;  %s172_s6 = smov [#allocation2]   ;;  %s124_s10 = scalar_lea.hbm %s210_s0, 128 }
   0x2   :  { %s14_s7 = sshll.u32 %s172_s6, 4  ;;  %p125_p0 = scmp.ne.s32.totalorder %s210_s0, %s124_s10  ;;  %s15_s7 = int_to_ptr.vmem [resolvable:$true] %s14_s7 }
   0x3   :  { %p128_p1 = scmp.lt.u32.totalorder %s124_s10, %s210_s0 }
   0x5   :  { %p130_p2 = pnand %p128_p1, %p125_p0 }
   0x7   :  { %133 = shalt.err (!%p130_p2)
}
   0x8   :  { %s134_s15 = scalar_lea.vmem %s15_s7, 128  ;;  %p139_p4 = scmp.lt.s32.totalorder %s15_s7, %s15_s7 }
   0x9   :  { %p135_p3 = scmp.ne.s32.totalorder %s15_s7, %s134_s15  ;;  %p140_p5 = scmp.lt.s32.totalorder %s134_s15, %s134_s15 }
   0xb   :  { %p141_p6 = por %p140_p5, %p139_p4 }
   0xd   :  { %p142_p7 = pnand %p141_p6, %p135_p3 }
   0xf   :  { %145 = shalt.err (!%p142_p7)
}
  0x10   :  { %17 = dma.hbm_to_vmem [thread:$0]  %s210_s0, 128, %s15_s7, [#allocation3]  }
  0x11   :  { %168 = dma.done.wait [#allocation3], 128  }
  0x12   :  { %169 = vsyncadd [#allocation3], 4294967168  ;;  %v22_v0 = vlaneseq  ;;  %v30_v5 = vld [vmem:[#allocation2] sm:$0xff]  ;;  %vm91_vm7 = vcmask 1040384   ;;  %vm92_vm8 = vsmask.f32 256 }
  0x13   :  { %v39_v6 = vrot.slane %v30_v5, 7  ;;  %v54_v7 = vrot.slane %v30_v5, 1  ;;  %v31_v9 = vpack.c.bf16 %v30_v5, %v30_v5  ;;  %vm97_vm9 = vcmask 1043459   ;;  %vm93_vm11 = vmand %vm91_vm7, %vm92_vm8  ;;  %s173_s0 = smov [#allocation5]  }
  0x14   :  { %v23_v1 = vshrl.u32 %v22_v0, 7  ;;  %vm98_vm10 = vsmask.f32 7950  ;;  %s109_s18 = sshll.u32 %s173_s0, 4  ;;  %s110_s18 = int_to_ptr.vmem [resolvable:$true] %s109_s18 }
  0x15   :  { %35 = vst [vmem:[#allocation5] sm:$0xf] %v31_v9  ;;  %vm99_vm12 = vmand %vm97_vm9, %vm98_vm10  ;;  %s146_s19 = scalar_lea.vmem %s110_s18, 192  ;;  %p151_p9 = scmp.lt.s32.totalorder %s110_s18, %s110_s18 }
  0x16   :  { %v70_v2 = vcvt.s32.f32 %v23_v1  ;;  %vm24_vm0 = vcmp.ge.s32.totalorder %v23_v1, 1  ;;  %vm27_vm1 = vcmp.lt.s32.totalorder %v23_v1, 7  ;;  %vm25_vm2 = vcmp.ge.s32.totalorder %v23_v1, 2  ;;  %p147_p8 = scmp.ne.s32.totalorder %s110_s18, %s146_s19  ;;  %p152_p10 = scmp.lt.s32.totalorder %s146_s19, %s146_s19 }
  0x17   :  { %v42_v10 = vsel %vm24_vm0, %v39_v6, 0.0  ;;  %v57_v11 = vsel %vm27_vm1, %v54_v7, 0.0  ;;  %vm28_vm3 = vcmp.lt.s32.totalorder %v23_v1, 6  ;;  %vm26_vm4 = vcmp.ge.s32.totalorder %v23_v1, 4 }
  0x18   :  { %v71_v3 = vmax.f32 %v70_v2, 1.0  ;;  %v76_v4 = vsub.f32 7.0, %v70_v2  ;;  %v43_v12 = vadd.f32 %v42_v10, %v30_v5  ;;  %v58_v13 = vadd.f32 %v57_v11, %v30_v5  ;;  %p153_p11 = por %p152_p10, %p151_p9 }
  0x19   :  { %vm29_vm5 = vcmp.lt.s32.totalorder %v23_v1, 4  ;;  %vm75_vm6 = vcmp.le.s32.totalorder %v23_v1, 6 }
  0x1a   :  { %v77_v8 = vmax.f32 %v76_v4, 1.0  ;;  %120 = vrcp.f32 %v71_v3  ;;  %v44_v14 = vrot.slane %v43_v12, 6  ;;  %v59_v15 = vrot.slane %v58_v13, 2  ;;  %p154_p12 = pnand %p153_p11, %p147_p8 }
  0x1c   :  { %122 = vrcp.f32 %v77_v8  ;;  %v47_v16 = vsel %vm25_vm2, %v44_v14, 0.0  ;;  %v62_v17 = vsel %vm28_vm3, %v59_v15, 0.0 }
  0x1d   :  { %v48_v18 = vadd.f32 %v47_v16, %v43_v12  ;;  %v63_v19 = vadd.f32 %v62_v17, %v58_v13 }
  0x1f   :  { %v49_v20 = vrot.slane %v48_v18, 4  ;;  %v64_v21 = vrot.slane %v63_v19, 4 }
  0x21   :  { %v52_v24 = vsel %vm26_vm4, %v49_v20, 0.0  ;;  %v67_v25 = vsel %vm29_vm5, %v64_v21, 0.0 }
  0x22   :  { %v53_v26 = vadd.f32 %v52_v24, %v48_v18  ;;  %v68_v27 = vadd.f32 %v67_v25, %v63_v19 }
  0x24   :  { %v121_v22 = vpop.eup %120  ;;  %v81_v30 = vsub.f32 %v53_v26, %v30_v5  ;;  %v84_v31 = vsub.f32 %v68_v27, %v30_v5 }
  0x25   :  { %v74_v28 = vsel %vm24_vm0, %v121_v22, 0.0 }
  0x26   :  { %v123_v23 = vpop.eup %122  ;;  %v83_v32 = vmul.f32 %v81_v30, %v74_v28 }
  0x27   :  { %v80_v29 = vsel %vm75_vm6, %v123_v23, 0.0 }
  0x28   :  { %v86_v33 = vmul.f32 %v84_v31, %v80_v29  ;;  %v87_v34 = vpack.c.bf16 %v83_v32, %v83_v32 }
  0x2a   :  { %v89_v35 = vpack.c.bf16 %v86_v33, %v86_v33  ;;  %88 = vst [vmem:[#allocation5 + $0x4] sm:$0xf] %v87_v34 }
  0x2c   :  { %90 = vst [vmem:[#allocation5 + $0x8] sm:$0xf] %v89_v35 }
  0x31   :  { %v94_v36 = vld [vmem:[#allocation5 + $0x4] sm:$0x1] }
  0x32   :  { %v95_v38 = vsel %vm93_vm11, 0, %v94_v36 }
  0x33   :  { %v100_v37 = vld [vmem:[#allocation5 + $0x8] sm:$0x8]  ;;  %96 = vst [vmem:[#allocation5 + $0x4] sm:$0x1] %v95_v38 }
  0x34   :  { %v101_v39 = vsel %vm99_vm12, 0, %v100_v37 }
  0x35   :  { %102 = vst [vmem:[#allocation5 + $0x8] sm:$0x8] %v101_v39 }
  0x36   :  { %157 = shalt.err (!%p154_p12)
}
  0x37   :  { %s158_s22 = scalar_lea.hbm %s211_s1, 192 }
  0x38   :  { %p159_p13 = scmp.ne.s32.totalorder %s211_s1, %s158_s22  ;;  %p162_p0 = scmp.lt.u32.totalorder %s158_s22, %s211_s1 }
  0x3a   :  { %p164_p1 = pnand %p162_p0, %p159_p13 }
  0x3c   :  { %167 = shalt.err (!%p164_p1)
}
  0x3d   :  { %112 = dma.vmem_to_hbm [thread:$0]  %s110_s18, 192, %s211_s1, [#allocation4]  }
  0x3e   :  { %170 = dma.done.wait [#allocation4], 192  }
  0x3f   :  { %171 = vsyncadd [#allocation4], 4294967104 }
  0x40   :  { %116 = vsyncpa [#allocation3], 1 }
  0x41   :  { %117 = vsyncpa [#allocation4], 1 }

</bundles_post_ra>
